<compile_context>
chip_gen: v5e
topology: v5e:2x2
jax: 0.10.0
libtpu: 0.0.40
codegen_flags: <defaults>
</compile_context>

<pallas_src>
import jax
import jax.numpy as jnp
from jax.experimental import pallas as pl
from jax.experimental.pallas import tpu as pltpu

LANE = 128  # pad hidden/out feature dims to the 128-lane granule


def mlp_kernel(x_ref, w1_ref, w2_ref, o_ref):
    # h = x @ W1  (W1 stored as (dim, h_pad) bf16 -> MXU-native (K, N) RHS).
    x_bf = x_ref[...].astype(jnp.bfloat16)
    h = jnp.dot(x_bf, w1_ref[...], preferred_element_type=jnp.float32)
    # y = h @ W2  (W2 stored as (h_pad, o_pad) bf16).  Re-quantize h to bf16
    # for native MXU rate; accumulation stays f32.
    y = jnp.dot(h.astype(jnp.bfloat16), w2_ref[...],
                preferred_element_type=jnp.float32)
    # ReLU after the second linear (matches the PyTorch forward), done in f32
    # on the VPU, then a lane-dense (B, 128) unmasked store.
    o_ref[...] = jnp.maximum(y, 0.0).astype(o_ref.dtype)


def mlp_forward_padded(x, w1_t, w2_t, *, dim, hidden_dim, out_dim):
    """x: (B, dim) f32.  w1_t: (dim, h_pad) bf16, w2_t: (h_pad, o_pad) bf16 --
    pre-transposed, pre-padded, pre-cast once at init.  Returns the padded
    (B, o_pad) output (lane-dense; keep padded end-to-end when possible)."""
    B, _ = x.shape
    o_pad = w2_t.shape[1]

    # Honest scheduling hint: true (unpadded) dims, actual byte widths.
    flops = 2 * B * dim * hidden_dim + 2 * B * hidden_dim * out_dim
    bytes_accessed = (4 * B * dim            # x (f32)
                      + 2 * dim * hidden_dim  # w1 (bf16)
                      + 2 * hidden_dim * out_dim  # w2 (bf16)
                      + 4 * B * out_dim)      # y (f32)

    return pl.pallas_call(
        mlp_kernel,
        out_shape=jax.ShapeDtypeStruct((B, o_pad), x.dtype),
        in_specs=[
            pl.BlockSpec(memory_space=pltpu.MemorySpace.VMEM),
            pl.BlockSpec(memory_space=pltpu.MemorySpace.VMEM),
            pl.BlockSpec(memory_space=pltpu.MemorySpace.VMEM),
        ],
        out_specs=pl.BlockSpec(memory_space=pltpu.MemorySpace.VMEM),
        cost_estimate=pl.CostEstimate(
            flops=flops, transcendentals=0, bytes_accessed=bytes_accessed),
    )(x, w1_t, w2_t)


def mlp_forward(x, w1_t, w2_t, *, dim, hidden_dim, out_dim):
    """Convenience wrapper matching the PyTorch output shape exactly.
    Prefer mlp_forward_padded if the consumer tolerates the padded lanes
    (avoids an extra XLA slice round-trip per call)."""
    y_pad = mlp_forward_padded(x, w1_t, w2_t,
                               dim=dim, hidden_dim=hidden_dim, out_dim=out_dim)
    return y_pad[:, :out_dim]


def init_mlp_params(key, dim, hidden_dim, out_dim):
    """nn.Linear-default-scale uniform init (bias=False).  Transpose to (K, N),
    zero-pad the lane dims to 128 granules, and cast to bf16 -- all ONCE here,
    outside the per-call path.  Zero pad rows/cols contribute exactly 0."""
    k1, k2 = jax.random.split(key)
    w1 = jax.random.uniform(
        k1, (hidden_dim, dim), dtype=jnp.float32,
        minval=-1.0 / jnp.sqrt(dim), maxval=1.0 / jnp.sqrt(dim))
    w2 = jax.random.uniform(
        k2, (out_dim, hidden_dim), dtype=jnp.float32,
        minval=-1.0 / jnp.sqrt(hidden_dim), maxval=1.0 / jnp.sqrt(hidden_dim))

    h_pad = max(LANE, ((hidden_dim + LANE - 1) // LANE) * LANE)
    o_pad = max(LANE, ((out_dim + LANE - 1) // LANE) * LANE)

    # (K, N) layouts: w1_t (dim, h_pad), w2_t (h_pad, o_pad) -- MXU-native RHS.
    w1_t = jnp.zeros((dim, h_pad), jnp.float32).at[:, :hidden_dim].set(w1.T)
    w2_t = jnp.zeros((h_pad, o_pad), jnp.float32).at[:hidden_dim, :out_dim].set(w2.T)
    return w1, w2, w1_t.astype(jnp.bfloat16), w2_t.astype(jnp.bfloat16)


if __name__ == "__main__":
    # Shapes consistent with the module: dim=32, hidden_dim=64, out_dim=10.
    B, dim, hidden_dim, out_dim = 8, 32, 64, 10

    key = jax.random.PRNGKey(0)
    kx, kp = jax.random.split(key)

    x = jax.random.normal(kx, (B, dim), dtype=jnp.float32)
    w1, w2, w1_t, w2_t = init_mlp_params(kp, dim, hidden_dim, out_dim)

    out = mlp_forward(x, w1_t, w2_t,
                      dim=dim, hidden_dim=hidden_dim, out_dim=out_dim)
    out = jax.block_until_ready(out)
    assert out.shape == (B, out_dim)

    # Parity reference: same bf16 quantization points as the kernel
    # (x, w1, w2 and the intermediate h rounded to bf16; f32 accumulation),
    # so only MXU accumulation-order differences remain.
    xb = x.astype(jnp.bfloat16).astype(jnp.float32)
    w1b = w1.astype(jnp.bfloat16).astype(jnp.float32)
    w2b = w2.astype(jnp.bfloat16).astype(jnp.float32)
    h_ref = (xb @ w1b.T).astype(jnp.bfloat16).astype(jnp.float32)
    ref_bf = jnp.maximum(h_ref @ w2b.T, 0.0)
    assert jnp.allclose(out, ref_bf, atol=2e-3, rtol=2e-3)

    # Loose sanity check against the pure-f32 PyTorch-semantics reference
    # (bf16 weight mantissa is the only approximation).
    ref_f32 = jnp.maximum((x @ w1.T) @ w2.T, 0.0)
    assert jnp.allclose(out, ref_f32, atol=5e-2, rtol=5e-2)

    print("KERNEL_OK")
</pallas_src>

<mosaic_0001>
module attributes {stable_mosaic.version = 11 : i64} {
  func.func @mlp_kernel(%arg0: memref<8x32xf32, #tpu.memory_space<vmem>>, %arg1: memref<32x128xbf16, #tpu.memory_space<vmem>>, %arg2: memref<128x128xbf16, #tpu.memory_space<vmem>>, %arg3: memref<8x128xf32, #tpu.memory_space<vmem>>) attributes {dimension_semantics = [], scalar_prefetch = 0 : i64, scratch_operands = 0 : i64, tpu.core_type = #tpu.core_type<tc>} {
    %c0 = arith.constant 0 : index
    %c0_0 = arith.constant 0 : index
    %0 = vector.load %arg0[%c0, %c0_0] : memref<8x32xf32, #tpu.memory_space<vmem>>, vector<8x32xf32>
    %1 = arith.truncf %0 : vector<8x32xf32> to vector<8x32xbf16>
    %c0_1 = arith.constant 0 : index
    %c0_2 = arith.constant 0 : index
    %2 = vector.load %arg1[%c0_1, %c0_2] : memref<32x128xbf16, #tpu.memory_space<vmem>>, vector<32x128xbf16>
    %cst = arith.constant dense<0.000000e+00> : vector<8x128xf32>
    %3 = tpu.matmul %1, %2, %cst {dimension_numbers = #tpu.dot_dimension_numbers<[1], [0], [0], [1], [0, 0, 1, 1], [], []>} : vector<8x32xbf16>, vector<32x128xbf16>, vector<8x128xf32> -> vector<8x128xf32>
    %4 = arith.truncf %3 : vector<8x128xf32> to vector<8x128xbf16>
    %c0_3 = arith.constant 0 : index
    %c0_4 = arith.constant 0 : index
    %5 = vector.load %arg2[%c0_3, %c0_4] : memref<128x128xbf16, #tpu.memory_space<vmem>>, vector<128x128xbf16>
    %cst_5 = arith.constant dense<0.000000e+00> : vector<8x128xf32>
    %6 = tpu.matmul %4, %5, %cst_5 {dimension_numbers = #tpu.dot_dimension_numbers<[1], [0], [0], [1], [0, 0, 1, 1], [], []>} : vector<8x128xbf16>, vector<128x128xbf16>, vector<8x128xf32> -> vector<8x128xf32>
    %cst_6 = arith.constant 0.000000e+00 : f32
    %7 = vector.broadcast %cst_6 : f32 to vector<8x128xf32>
    %8 = arith.maximumf %6, %7 : vector<8x128xf32>
    %c0_7 = arith.constant 0 : index
    %c0_8 = arith.constant 0 : index
    %9 = vector.load %arg3[%c0_7, %c0_8] : memref<8x128xf32, #tpu.memory_space<vmem>>, vector<8x128xf32>
    tpu.vector_store %arg3[%c0_7, %c0_8], %8 {strides = array<i32>} : memref<8x128xf32, #tpu.memory_space<vmem>>, vector<8x128xf32>,
    return
  }
}

</mosaic_0001>

<bundles_post_ra>
// kernel: tpu_custom_call.1
= control target key start
LH: loop header
LB: loop body
LE: loop exit
PB: predicated region body
PF: predicated region fallthrough
CT: control target
= control target key end

     0   :  { %8 = vsyncpa [#allocation3], 0  ;;  %s391_s0 = inlined_call_operand.hbm [shape: f32[8,32], index: 0, kind: input, shape index: {}]   ;;  %s392_s1 = inlined_call_operand.hbm [shape: bf16[32,128], index: 1, kind: input, shape index: {}]   ;;  %s393_s2 = inlined_call_operand.hbm [shape: bf16[128,128], index: 2, kind: input, shape index: {}]   ;;  %s394_s3 = inlined_call_operand.hbm [shape: f32[8,128], index: 3, kind: output, shape index: {}]  }
   0x1   :  { %9 = vsyncpa [#allocation6], 0  ;;  %s26_s14 = sshll.u32 %s392_s1, 4  ;;  %s27_s14 = int_to_ptr.hbm [resolvable:$true] %s26_s14 }
   0x2   :  { %10 = vsyncpa [#allocation4], 0  ;;  %s353_s15 = smov [#allocation5]   ;;  %s16_s19 = sshll.u32 %s391_s0, 4  ;;  %s17_s19 = int_to_ptr.hbm [resolvable:$true] %s16_s19 }
   0x3   :  { %s28_s16 = sshll.u32 %s353_s15, 4  ;;  %s354_s20 = smov 64   ;;  %s29_s16 = int_to_ptr.vmem [resolvable:$true] %s28_s16 }
   0x4   :  { %s355_s21 = smov 4   ;;  %s356_s22 = smov [#allocation2]  }
   0x5   :  { %34 = dma.hbm_to_vmem [thread:$0]  %s27_s14, 256, %s29_s16, [#allocation6], %s354_s20, %s354_s20, %s355_s21  }
   0x6   :  { %s18_s23 = sshll.u32 %s356_s22, 4  ;;  %s39_s26 = sshll.u32 %s393_s2, 4  ;;  %s19_s23 = int_to_ptr.vmem [resolvable:$true] %s18_s23  ;;  %s40_s26 = int_to_ptr.hbm [resolvable:$true] %s39_s26 }
   0x7   :  { %21 = dma.hbm_to_vmem [thread:$0]  %s17_s19, 128, %s19_s23, [#allocation3]  }
   0x8   :  { %s357_s1 = smov [#allocation7]  }
   0x9   :  { %s41_s27 = sshll.u32 %s357_s1, 4  ;;  %s42_s27 = int_to_ptr.vmem [resolvable:$true] %s41_s27 }
   0xa   :  { %47 = dma.hbm_to_vmem [thread:$0]  %s40_s26, 1024, %s42_s27, [#allocation6], %s354_s20, %s354_s20, %s355_s21  }
   0xb   :  { %347 = dma.done.wait [#allocation3], 128  }
   0xc   :  { %348 = vsyncadd [#allocation3], 4294967168 }
   0xd   :  { %349 = dma.done.wait [#allocation6], 1280  }
   0xe   :  { %350 = vsyncadd [#allocation6], 4294966016  ;;  %v236_v0 = vld [vmem:[#allocation5 + $0x8] sm:$0xff]  ;;  %v235_v2 = vld [vmem:[#allocation5] sm:$0xff]  ;;  %vm79_vm0 = vcmask 261120   ;;  %s358_s0 = smov [#allocation8]  }
   0xf   :  { %v244_v1 = vld [vmem:[#allocation7 + $0x38] sm:$0xff]  ;;  %89 = vmatpush.bf16.msra.mxu0 %v236_v0  ;;  %v61_v3 = vld [vmem:[#allocation2] sm:$0xff]  ;;  %v243_v4 = vld [vmem:[#allocation7 + $0x30] sm:$0xff]  ;;  %s181_s2 = sshll.u32 %s358_s0, 4  ;;  %s183_s30 = sshll.u32 %s394_s3, 4  ;;  %s182_s2 = int_to_ptr.vmem [resolvable:$true] %s181_s2  ;;  %s184_s30 = int_to_ptr.hbm [resolvable:$true] %s183_s30 }
  0x10   :  { %161 = vmatpush.bf16.msra.mxu1 %v244_v1  ;;  %v62_v5 = vpack.c.bf16 %v61_v3, %v61_v3  ;;  %v242_v6 = vld [vmem:[#allocation7 + $0x28] sm:$0xff]  ;;  %v241_v7 = vld [vmem:[#allocation7 + $0x20] sm:$0xff]  ;;  %v240_v8 = vld [vmem:[#allocation7 + $0x18] sm:$0xff] }
  0x11   :  { %v239_v9 = vld [vmem:[#allocation7 + $0x10] sm:$0xff]  ;;  %v238_v10 = vld [vmem:[#allocation7 + $0x8] sm:$0xff]  ;;  %v237_v11 = vld [vmem:[#allocation7] sm:$0xff] }
  0x13   :  { %90 = vmatpush.bf16.msra.mxu0 %v235_v2 }
  0x14   :  { %162 = vmatpush.bf16.msra.mxu1 %v243_v4 }
  0x16   :  { %202 = vmatmul.msk.bf16.vlgmr.msra.gmra.mxu0 %vm79_vm0, %v62_v5 }
  0x18   :  { %163 = vmatpush.bf16.msra.mxu1 %v242_v6 }
  0x1c   :  { %164 = vmatpush.bf16.msra.mxu1 %v241_v7 }
  0x20   :  { %165 = vmatpush.bf16.msra.mxu1 %v240_v8 }
  0x24   :  { %166 = vmatpush.bf16.msra.mxu1 %v239_v9 }
  0x28   :  { %167 = vmatpush.bf16.msra.mxu1 %v238_v10 }
  0x2c   :  { %168 = vmatpush.bf16.msra.mxu1 %v237_v11 }
  0x93   :  { %v92_v12 = vpop.f32.mrf.mxu0 }
  0x94   :  { %v96_v13 = vpack.c.bf16 %v92_v12, %v92_v12 }
  0x96   :  { %169 = vmatmul.bf16.vlgmr.msra.gmra.mxu1 %v96_v13 }
  0x9b   :  { %v94_v14 = vpop.f32.mrf.mxu0 }
 0x113   :  { %v170_v15 = vpop.f32.mrf.mxu1 }
 0x114   :  { %v174_v16 = vmax.f32 %v170_v15, 0.0 }
 0x116   :  { %175 = vst [vmem:[#allocation8] sm:$0xff] %v174_v16 }
 0x117   :  { %186 = dma.vmem_to_hbm [thread:$0]  %s182_s2, 128, %s184_s30, [#allocation4]  }
 0x11b   :  { %v172_v17 = vpop.f32.mrf.mxu1 }
 0x11c   :  { %351 = dma.done.wait [#allocation4], 128  }
 0x11d   :  { %352 = vsyncadd [#allocation4], 4294967168 }
 0x11e   :  { %191 = vsyncpa [#allocation3], 1 }
 0x11f   :  { %192 = vsyncpa [#allocation6], 1 }
 0x120   :  { %193 = vsyncpa [#allocation4], 1 }

</bundles_post_ra>
